<compile_context>
chip_gen: v6e
topology: v6e:2x2x1
jax: 0.10.0
libtpu: 0.0.40
codegen_flags: <defaults>
</compile_context>

<pallas_src>
import functools

import jax
import jax.numpy as jnp
from jax.experimental import pallas as pl
from jax.experimental.pallas import tpu as pltpu


def _round_up(x, m):
    return (x + m - 1) // m * m


def _llama_mlp_kernel(x_ref, wgu_ref, wd_ref, o_ref, acc_ref):
    # x_ref   : [tm, H]       token tile (input dtype, e.g. bf16)
    # wgu_ref : [H, 2*ti]     fused [gate | up] weight tile for I-tile k
    # wd_ref  : [ti, H]       down_proj weight tile for I-tile k
    # o_ref   : [tm, H]       output tile (written on last k)
    # acc_ref : [tm, H] f32   VMEM accumulator, resident across the k axis
    k = pl.program_id(1)

    @pl.when(k == 0)
    def _():
        acc_ref[...] = jnp.zeros_like(acc_ref)

    x = x_ref[...]
    # One fused MXU pass computes gate_proj and up_proj with f32 accumulation.
    gu = jnp.dot(x, wgu_ref[...], preferred_element_type=jnp.float32)
    ti = gu.shape[-1] // 2
    gate = gu[:, :ti]
    up = gu[:, ti:]
    # SiLU(gate) * up in f32 (sigmoid -> EUP), cast for the down-proj matmul.
    hidden = (gate * jax.nn.sigmoid(gate)) * up
    acc_ref[...] += jnp.dot(hidden.astype(wd_ref.dtype), wd_ref[...],
                            preferred_element_type=jnp.float32)

    @pl.when(k == pl.num_programs(1) - 1)
    def _():
        o_ref[...] = acc_ref[...].astype(o_ref.dtype)


@functools.partial(jax.jit, static_argnames=("token_tile", "i_tile"))
def llama_mlp(x, w_gate_t, w_up_t, w_down_t, *, token_tile=256, i_tile=512):
    """x: [B, S, H]; weights in math layout (see header)."""
    B, S, H = x.shape
    I = w_gate_t.shape[1]
    dtype = x.dtype
    tokens = B * S

    # ---- tile sizing -------------------------------------------------------
    # Token (M) tile: cover all tokens when few (decode -> each weight tile
    # streamed exactly once), otherwise a large MXU-friendly tile (prefill).
    tm = min(token_tile, _round_up(tokens, 8))
    tokens_pad = _round_up(tokens, tm)
    n_tok_tiles = tokens_pad // tm
    # Intermediate (I) tile: lane-aligned, sized so double-buffered weight
    # tiles + accumulator fit VMEM comfortably even on v7x (64 MiB / TC).
    ti = min(i_tile, _round_up(I, 128))
    ti = max(128, _round_up(ti, 128))
    I_pad = _round_up(I, ti)
    nk = I_pad // ti

    # ---- pad / pack (one-time; real models would pre-pack the weights) ----
    x2d = x.reshape(tokens, H)
    if tokens_pad != tokens:
        x2d = jnp.pad(x2d, ((0, tokens_pad - tokens), (0, 0)))
    if I_pad != I:
        # Zero padding is exact: silu(0) * up = 0 and padded down rows are 0.
        w_gate_t = jnp.pad(w_gate_t, ((0, 0), (0, I_pad - I)))
        w_up_t = jnp.pad(w_up_t, ((0, 0), (0, I_pad - I)))
        w_down_t = jnp.pad(w_down_t, ((0, I_pad - I), (0, 0)))

    # Fuse gate/up per I-tile: w_gu[k] = concat(gate[:, k*ti:(k+1)*ti],
    #                                           up  [:, k*ti:(k+1)*ti], -1)
    wg3 = w_gate_t.reshape(H, nk, ti).transpose(1, 0, 2)   # [nk, H, ti]
    wu3 = w_up_t.reshape(H, nk, ti).transpose(1, 0, 2)     # [nk, H, ti]
    w_gu = jnp.concatenate([wg3, wu3], axis=-1)            # [nk, H, 2*ti]

    # ---- VMEM budget & cost hint ------------------------------------------
    act_b = jnp.dtype(dtype).itemsize
    w_b = jnp.dtype(w_gu.dtype).itemsize
    vmem_est = (2 * tm * H * act_b            # x tile, double buffered
                + 2 * H * (2 * ti) * w_b      # fused gate|up tile
                + 2 * ti * H * w_b            # down tile
                + 2 * tm * H * act_b          # output tile
                + tm * H * 4)                 # f32 accumulator
    vmem_limit = min(max(vmem_est + vmem_est // 2, 32 * 1024 * 1024),
                     64 * 1024 * 1024)

    cost = pl.CostEstimate(
        flops=6 * tokens_pad * H * I_pad,
        transcendentals=tokens_pad * I_pad,
        bytes_accessed=(2 * tokens_pad * H * act_b
                        + n_tok_tiles * 3 * H * I_pad * w_b),
    )

    out2d = pl.pallas_call(
        _llama_mlp_kernel,
        out_shape=jax.ShapeDtypeStruct((tokens_pad, H), dtype),
        grid_spec=pltpu.PrefetchScalarGridSpec(
            num_scalar_prefetch=0,
            grid=(n_tok_tiles, nk),                      # tokens outer, I (reduction) last
            in_specs=[
                pl.BlockSpec((tm, H), lambda i, k: (i, 0)),               # x tile
                pl.BlockSpec((None, H, 2 * ti), lambda i, k: (k, 0, 0)),  # gate|up tile
                pl.BlockSpec((ti, H), lambda i, k: (k, 0)),               # down tile
            ],
            out_specs=pl.BlockSpec((tm, H), lambda i, k: (i, 0)),
            scratch_shapes=[pltpu.VMEM((tm, H), jnp.float32)],
        ),
        compiler_params=pltpu.CompilerParams(
            dimension_semantics=("parallel", "arbitrary"),
            vmem_limit_bytes=int(vmem_limit)),
        cost_estimate=cost,
    )(x2d, w_gu, w_down_t)

    return out2d[:tokens].reshape(B, S, H)


# TODO(synk): pretraining_tp > 1 path not implemented; it is mathematically
# identical to the tp == 1 computation above (just a sliced formulation).


if __name__ == "__main__":
    def ref_mlp(x, wg_t, wu_t, wd_t):
        xf = x.astype(jnp.float32)
        gate = xf @ wg_t.astype(jnp.float32)
        up = xf @ wu_t.astype(jnp.float32)
        return (jax.nn.silu(gate) * up) @ wd_t.astype(jnp.float32)

    key = jax.random.PRNGKey(0)

    # Test 1: f32, H/I multiples of 128, multi-tile I (exercises accumulation).
    B, S, H, I = 2, 8, 128, 256
    kx, kg, ku, kd, key = jax.random.split(key, 5)
    x = jax.random.normal(kx, (B, S, H), dtype=jnp.float32)
    # torch nn.Linear weight shapes: gate/up [I, H], down [H, I]
    w_gate = jax.random.normal(kg, (I, H), dtype=jnp.float32) * 0.05
    w_up = jax.random.normal(ku, (I, H), dtype=jnp.float32) * 0.05
    w_down = jax.random.normal(kd, (H, I), dtype=jnp.float32) * 0.05

    out = llama_mlp(x, w_gate.T, w_up.T, w_down.T, i_tile=128)
    out = jax.block_until_ready(out)
    ref = ref_mlp(x, w_gate.T, w_up.T, w_down.T)
    assert out.shape == (B, S, H)
    assert jnp.allclose(out, ref, atol=1e-4, rtol=1e-4), "f32 mismatch vs reference"

    # Test 2: bf16 weights/activations, ragged token count and ragged I
    # (exercises token/I padding and f32 accumulation of bf16 MXU matmuls).
    B, S, H, I = 1, 13, 128, 320
    kx, kg, ku, kd, key = jax.random.split(key, 5)
    x = jax.random.normal(kx, (B, S, H), dtype=jnp.float32)
    w_gate = jax.random.normal(kg, (I, H), dtype=jnp.float32) * 0.05
    w_up = jax.random.normal(ku, (I, H), dtype=jnp.float32) * 0.05
    w_down = jax.random.normal(kd, (H, I), dtype=jnp.float32) * 0.05

    bf = jnp.bfloat16
    out_bf = llama_mlp(x.astype(bf), w_gate.T.astype(bf), w_up.T.astype(bf),
                       w_down.T.astype(bf), i_tile=128)
    out_bf = jax.block_until_ready(out_bf)
    ref_bf = ref_mlp(x.astype(bf), w_gate.T.astype(bf), w_up.T.astype(bf),
                     w_down.T.astype(bf))
    assert out_bf.shape == (B, S, H)
    assert jnp.allclose(out_bf.astype(jnp.float32), ref_bf,
                        atol=5e-2, rtol=5e-2), "bf16 mismatch vs reference"

    print("KERNEL_OK")
</pallas_src>

<mosaic_0001>
module attributes {stable_mosaic.version = 11 : i64} {
  func.func @_llama_mlp_kernel(%arg0: i32, %arg1: i32, %arg2: memref<16x128xf32, #tpu.memory_space<vmem>>, %arg3: memref<1x128x256xf32, #tpu.memory_space<vmem>>, %arg4: memref<128x128xf32, #tpu.memory_space<vmem>>, %arg5: memref<16x128xf32, #tpu.memory_space<vmem>>, %arg6: memref<16x128xf32, #tpu.memory_space<vmem>>) attributes {dimension_semantics = [#tpu.dimension_semantics<parallel>, #tpu.dimension_semantics<arbitrary>], iteration_bounds = array<i64: 1, 2>, scalar_prefetch = 0 : i64, scratch_operands = 1 : i64, tpu.core_type = #tpu.core_type<tc>, window_params = [{transform_indices = @transform_0, window_bounds = array<i64: 16, 128>}, {transform_indices = @transform_1, window_bounds = array<i64: 1, 128, 256>}, {transform_indices = @transform_2, window_bounds = array<i64: 128, 128>}, {transform_indices = @transform_3, window_bounds = array<i64: 16, 128>}]} {
    %c0_i32 = arith.constant 0 : i32
    %0 = arith.cmpi eq, %arg1, %c0_i32 : i32
    %1 = arith.extui %0 : i1 to i32
    %c0_i32_0 = arith.constant 0 : i32
    %2 = arith.cmpi ne, %1, %c0_i32_0 : i32
    scf.if %2 {
      %cst_14 = arith.constant 0.000000e+00 : f32
      %24 = vector.broadcast %cst_14 : f32 to vector<16x128xf32>
      %c0_15 = arith.constant 0 : index
      %c0_16 = arith.constant 0 : index
      %25 = vector.load %arg6[%c0_15, %c0_16] : memref<16x128xf32, #tpu.memory_space<vmem>>, vector<16x128xf32>
      tpu.vector_store %arg6[%c0_15, %c0_16], %24 {strides = array<i32>} : memref<16x128xf32, #tpu.memory_space<vmem>>, vector<16x128xf32>,
    } else {
    }
    %c0 = arith.constant 0 : index
    %c0_1 = arith.constant 0 : index
    %3 = vector.load %arg2[%c0, %c0_1] : memref<16x128xf32, #tpu.memory_space<vmem>>, vector<16x128xf32>
    %c0_2 = arith.constant 0 : index
    %c0_3 = arith.constant 0 : index
    %c0_4 = arith.constant 0 : index
    %4 = vector.load %arg3[%c0_2, %c0_3, %c0_4] : memref<1x128x256xf32, #tpu.memory_space<vmem>>, vector<1x128x256xf32>
    %5 = vector.shape_cast %4 : vector<1x128x256xf32> to vector<128x256xf32>
    %cst = arith.constant dense<0.000000e+00> : vector<16x256xf32>
    %6 = tpu.matmul %3, %5, %cst {dimension_numbers = #tpu.dot_dimension_numbers<[1], [0], [0], [1], [0, 0, 1, 1], [], []>} : vector<16x128xf32>, vector<128x256xf32>, vector<16x256xf32> -> vector<16x256xf32>
    %7 = vector.extract_strided_slice %6 {offsets = [0, 0], sizes = [16, 128], strides = [1, 1]} : vector<16x256xf32> to vector<16x128xf32>
    %8 = vector.extract_strided_slice %6 {offsets = [0, 128], sizes = [16, 128], strides = [1, 1]} : vector<16x256xf32> to vector<16x128xf32>
    %9 = arith.negf %7 : vector<16x128xf32>
    %10 = math.exp %9 : vector<16x128xf32>
    %cst_5 = arith.constant 1.000000e+00 : f32
    %11 = vector.broadcast %cst_5 : f32 to vector<16x128xf32>
    %12 = arith.addf %11, %10 : vector<16x128xf32>
    %13 = arith.divf %11, %12 : vector<16x128xf32>
    %14 = arith.mulf %7, %13 : vector<16x128xf32>
    %15 = arith.mulf %14, %8 : vector<16x128xf32>
    %c0_6 = arith.constant 0 : index
    %c0_7 = arith.constant 0 : index
    %16 = vector.load %arg6[%c0_6, %c0_7] : memref<16x128xf32, #tpu.memory_space<vmem>>, vector<16x128xf32>
    %c0_8 = arith.constant 0 : index
    %c0_9 = arith.constant 0 : index
    %17 = vector.load %arg4[%c0_8, %c0_9] : memref<128x128xf32, #tpu.memory_space<vmem>>, vector<128x128xf32>
    %cst_10 = arith.constant dense<0.000000e+00> : vector<16x128xf32>
    %18 = tpu.matmul %15, %17, %cst_10 {dimension_numbers = #tpu.dot_dimension_numbers<[1], [0], [0], [1], [0, 0, 1, 1], [], []>} : vector<16x128xf32>, vector<128x128xf32>, vector<16x128xf32> -> vector<16x128xf32>
    %19 = arith.addf %16, %18 : vector<16x128xf32>
    %c0_11 = arith.constant 0 : index
    %c0_12 = arith.constant 0 : index
    %20 = vector.load %arg6[%c0_11, %c0_12] : memref<16x128xf32, #tpu.memory_space<vmem>>, vector<16x128xf32>
    tpu.vector_store %arg6[%c0_11, %c0_12], %19 {strides = array<i32>} : memref<16x128xf32, #tpu.memory_space<vmem>>, vector<16x128xf32>,
    %c1_i32 = arith.constant 1 : i32
    %21 = arith.cmpi eq, %arg1, %c1_i32 : i32
    %22 = arith.extui %21 : i1 to i32
    %c0_i32_13 = arith.constant 0 : i32
    %23 = arith.cmpi ne, %22, %c0_i32_13 : i32
    scf.if %23 {
      %c0_14 = arith.constant 0 : index
      %c0_15 = arith.constant 0 : index
      %24 = vector.load %arg6[%c0_14, %c0_15] : memref<16x128xf32, #tpu.memory_space<vmem>>, vector<16x128xf32>
      %c0_16 = arith.constant 0 : index
      %c0_17 = arith.constant 0 : index
      %25 = vector.load %arg5[%c0_16, %c0_17] : memref<16x128xf32, #tpu.memory_space<vmem>>, vector<16x128xf32>
      tpu.vector_store %arg5[%c0_16, %c0_17], %24 {strides = array<i32>} : memref<16x128xf32, #tpu.memory_space<vmem>>, vector<16x128xf32>,
    } else {
    }
    return
  }
  func.func @transform_0(%arg0: i32, %arg1: i32) -> (i32, i32) {
    %c0_i32 = arith.constant 0 : i32
    %c0_i32_0 = arith.constant 0 : i32
    return %arg0, %c0_i32 : i32, i32
  }
  func.func @transform_1(%arg0: i32, %arg1: i32) -> (i32, i32, i32) {
    %c0_i32 = arith.constant 0 : i32
    %c0_i32_0 = arith.constant 0 : i32
    %c0_i32_1 = arith.constant 0 : i32
    return %arg1, %c0_i32, %c0_i32_0 : i32, i32, i32
  }
  func.func @transform_2(%arg0: i32, %arg1: i32) -> (i32, i32) {
    %c0_i32 = arith.constant 0 : i32
    %c0_i32_0 = arith.constant 0 : i32
    return %arg1, %c0_i32 : i32, i32
  }
  func.func @transform_3(%arg0: i32, %arg1: i32) -> (i32, i32) {
    %c0_i32 = arith.constant 0 : i32
    %c0_i32_0 = arith.constant 0 : i32
    return %arg0, %c0_i32 : i32, i32
  }
}

</mosaic_0001>

<bundles_post_ra>
// kernel: llama_mlp.1
= control target key start
LH: loop header
LB: loop body
LE: loop exit
PB: predicated region body
PF: predicated region fallthrough
CT: control target
= control target key end

     0   :  { %8 = vsyncpa [#allocation4], 0  ;;  %s737_s12 = smov 0   ;;  %s739_s13 = smov 0   ;;  %s853_s0 = inlined_call_operand.vmem [shape: f32[16,128], index: 0, kind: input, shape index: {}]   ;;  %s854_s1 = inlined_call_operand.vmem [shape: f32[2,128,256], index: 1, kind: input, shape index: {}]   ;;  %s855_s2 = inlined_call_operand.vmem [shape: f32[256,128], index: 2, kind: input, shape index: {}]   ;;  %s856_s3 = inlined_call_operand.hbm [shape: f32[16,128], index: 3, kind: output, shape index: {}]  }
   0x1   :  { %s741_s14 = smov 0  }
   0x2 LB: > { %s546_s15 = sadd.s32 4294967295, %s710_s14   ;;  %s23_s16 = sadd.s32 1, %s706_s13  ;;  %s710_s14 = sphi %s741_s14, %s14_s14   ;;  %s706_s13 = sphi %s739_s13, %s859_s13   ;;  %s702_s12 = sphi %s737_s12, %s858_s12  }
   0x3   : > { %p24_p0 = scmp.ge.s32.totalorder %s23_s16, 2  ;;  %p550_p1 = scmp.ge.s32.totalorder %s710_s14, 1 }
   0x4   : > { %p172_p2 = scmp.lt.s32.totalorder %s710_s14, 3 }
   0x5   : > { %s861_s16 = smov (%p24_p0, %s23_s16), 0 }
   0x6   : > { %p173_p3 = pnand %p550_p1, %p172_p2 }
   0x7   : > { %p207_p4 = scmp.lt.s32.totalorder (!%p173_p3), %s702_s12, 1  ;;  %s553_s17 = sshll.u32 (!%p173_p3), %s702_s12, 4 }
   0x8   : > { %176 = sbr.rel (%p173_p3) target bundleno = 509 (0x1fd), region = 32  ;;  %p213_p5 = scmp.lt.s32.totalorder (!%p173_p3), %s553_s17, 31 }
   0x9   : > { %p555_p6 = scmp.ne.s32.totalorder (!%p173_p3), %s702_s12, 0 }
   0xd   : > { %s208_s18 = scalar_select %p207_p4, %s702_s12, 1 }
   0xe   : > { %s863_s17 = smov (!%p213_p5, %s553_s17), 31  ;;  %222 = sbr.rel (%p555_p6) target bundleno = 21 (0x15), region = 36 }
   0xf   : > { %s563_s19 = sshll.u32 %s208_s18, 8  ;;  %s554_s23 = sshll.u32 %s863_s17, 3 }
  0x10   : > { %s764_s22 = scalar_lea.vmem %s854_s1, %s563_s19  ;;  %s769_s26 = scalar_lea.vmem %s855_s2, %s554_s23 }
  0x13   : > { %v712_v0 = vmov 0.0  }
  0x14   : > { %223 = vst [vmem:[#allocation2] sm:$0xff] %v712_v0  ;;  %224 = vst [vmem:[#allocation2 + $0x8] sm:$0xff] %v712_v0 }
  0x15 PF: > { %v258_v1 = vld [vmem:[%s764_s22 + $0xf8] sm:$0xff]  ;;  %v257_v2 = vld [vmem:[%s764_s22 + $0xf0] sm:$0xff]  ;;  %v256_v3 = vld [vmem:[%s764_s22 + $0xe8] sm:$0xff]  ;;  %v713_v5 = vmov 0.0   ;;  %p558_p7 = scmp.ne.s32.totalorder %s702_s12, 1 }
  0x16   : > { %259 = vmatprep.subr.mxu0 %v258_v1  ;;  %v255_v4 = vld [vmem:[%s764_s22 + $0xe0] sm:$0xff]  ;;  %323 = vmatprep.mubr.f32.mxu0 %v713_v5  ;;  %v254_v6 = vld [vmem:[%s764_s22 + $0xd8] sm:$0xff]  ;;  %v253_v7 = vld [vmem:[%s764_s22 + $0xd0] sm:$0xff] }
  0x17   : > { %260 = vmatpush1.msra.mxu0 %v257_v2  ;;  %v252_v8 = vld [vmem:[%s764_s22 + $0xc8] sm:$0xff]  ;;  %v251_v9 = vld [vmem:[%s764_s22 + $0xc0] sm:$0xff]  ;;  %v250_v10 = vld [vmem:[%s764_s22 + $0xb8] sm:$0xff] }
  0x18   : > { %261 = vmatprep.subr.mxu0 %v256_v3  ;;  %v249_v11 = vld [vmem:[%s764_s22 + $0xb0] sm:$0xff]  ;;  %v248_v12 = vld [vmem:[%s764_s22 + $0xa8] sm:$0xff]  ;;  %v247_v13 = vld [vmem:[%s764_s22 + $0xa0] sm:$0xff] }
  0x19   : > { %262 = vmatpush1.msra.mxu0 %v255_v4  ;;  %v246_v14 = vld [vmem:[%s764_s22 + $0x98] sm:$0xff]  ;;  %v245_v15 = vld [vmem:[%s764_s22 + $0x90] sm:$0xff]  ;;  %v244_v16 = vld [vmem:[%s764_s22 + $0x88] sm:$0xff] }
  0x1a   : > { %263 = vmatprep.subr.mxu0 %v254_v6  ;;  %v243_v17 = vld [vmem:[%s764_s22 + $0x80] sm:$0xff]  ;;  %v242_v18 = vld [vmem:[%s764_s22 + $0x78] sm:$0xff]  ;;  %v241_v19 = vld [vmem:[%s764_s22 + $0x70] sm:$0xff] }
  0x1b   : > { %264 = vmatpush1.msra.mxu0 %v253_v7  ;;  %v240_v20 = vld [vmem:[%s764_s22 + $0x68] sm:$0xff]  ;;  %v239_v21 = vld [vmem:[%s764_s22 + $0x60] sm:$0xff]  ;;  %v238_v22 = vld [vmem:[%s764_s22 + $0x58] sm:$0xff] }
  0x1c   : > { %265 = vmatprep.subr.mxu0 %v252_v8  ;;  %v237_v23 = vld [vmem:[%s764_s22 + $0x50] sm:$0xff]  ;;  %v236_v24 = vld [vmem:[%s764_s22 + $0x48] sm:$0xff]  ;;  %v235_v25 = vld [vmem:[%s764_s22 + $0x40] sm:$0xff] }
  0x1d   : > { %266 = vmatpush1.msra.mxu0 %v251_v9  ;;  %v234_v26 = vld [vmem:[%s764_s22 + $0x38] sm:$0xff]  ;;  %v233_v27 = vld [vmem:[%s764_s22 + $0x30] sm:$0xff]  ;;  %v232_v28 = vld [vmem:[%s764_s22 + $0x28] sm:$0xff] }
  0x1e   : > { %267 = vmatprep.subr.mxu0 %v250_v10  ;;  %v231_v29 = vld [vmem:[%s764_s22 + $0x20] sm:$0xff]  ;;  %v230_v30 = vld [vmem:[%s764_s22 + $0x18] sm:$0xff]  ;;  %v229_v31 = vld [vmem:[%s764_s22 + $0x10] sm:$0xff] }
  0x1f   : > { %268 = vmatpush1.msra.mxu0 %v249_v11  ;;  %v228_v32 = vld [vmem:[%s764_s22 + $0x8] sm:$0xff]  ;;  %v227_v33 = vld [vmem:[%s764_s22] sm:$0xff]  ;;  %v369_v36 = vld [vmem:[%s769_s26 + $0x78] sm:$0xff] }
  0x20   : > { %269 = vmatprep.subr.mxu0 %v248_v12  ;;  %v225_v34 = vld [vmem:[%s853_s0] sm:$0xff]  ;;  %v226_v35 = vld [vmem:[%s853_s0 + $0x8] sm:$0xff]  ;;  %582 = vmatprep.subr.mxu1 %v369_v36  ;;  %v368_v37 = vld [vmem:[%s769_s26 + $0x70] sm:$0xff] }
  0x21   : > { %270 = vmatpush1.msra.mxu0 %v247_v13  ;;  %583 = vmatpush3.msra.mxu1 %v369_v36  ;;  %v367_v38 = vld [vmem:[%s769_s26 + $0x68] sm:$0xff]  ;;  %v366_v39 = vld [vmem:[%s769_s26 + $0x60] sm:$0xff]  ;;  %v365_v40 = vld [vmem:[%s769_s26 + $0x58] sm:$0xff] }
  0x22   : > { %271 = vmatprep.subr.mxu0 %v246_v14  ;;  %584 = vmatprep.subr.mxu1 %v368_v37  ;;  %v364_v41 = vld [vmem:[%s769_s26 + $0x50] sm:$0xff]  ;;  %v363_v42 = vld [vmem:[%s769_s26 + $0x48] sm:$0xff]  ;;  %v362_v43 = vld [vmem:[%s769_s26 + $0x40] sm:$0xff] }
  0x23   : > { %272 = vmatpush1.msra.mxu0 %v245_v15  ;;  %585 = vmatpush3.msra.mxu1 %v368_v37  ;;  %v361_v44 = vld [vmem:[%s769_s26 + $0x38] sm:$0xff]  ;;  %v360_v45 = vld [vmem:[%s769_s26 + $0x30] sm:$0xff]  ;;  %v359_v46 = vld [vmem:[%s769_s26 + $0x28] sm:$0xff] }
  0x24   : > { %273 = vmatprep.subr.mxu0 %v244_v16  ;;  %586 = vmatprep.subr.mxu1 %v367_v38  ;;  %v358_v47 = vld [vmem:[%s769_s26 + $0x20] sm:$0xff]  ;;  %v357_v48 = vld [vmem:[%s769_s26 + $0x18] sm:$0xff]  ;;  %v356_v49 = vld [vmem:[%s769_s26 + $0x10] sm:$0xff] }
  0x25   : > { %274 = vmatpush1.msra.mxu0 %v243_v17  ;;  %587 = vmatpush3.msra.mxu1 %v367_v38  ;;  %v355_v50 = vld [vmem:[%s769_s26 + $0x8] sm:$0xff]  ;;  %v354_v51 = vld [vmem:[%s769_s26] sm:$0xff] }
  0x26   : > { %275 = vmatprep.subr.mxu0 %v242_v18  ;;  %588 = vmatprep.subr.mxu1 %v366_v39  ;;  %v353_v4 = vld [vmem:[#allocation2 + $0x8] sm:$0xff]  ;;  %v352_v6 = vld [vmem:[#allocation2] sm:$0xff] }
  0x27   : > { %276 = vmatpush1.msra.mxu0 %v241_v19  ;;  %589 = vmatpush3.msra.mxu1 %v366_v39 }
  0x28   : > { %277 = vmatprep.subr.mxu0 %v240_v20  ;;  %590 = vmatprep.subr.mxu1 %v365_v40 }
  0x29   : > { %278 = vmatpush1.msra.mxu0 %v239_v21  ;;  %591 = vmatpush3.msra.mxu1 %v365_v40 }
  0x2a   : > { %279 = vmatprep.subr.mxu0 %v238_v22  ;;  %592 = vmatprep.subr.mxu1 %v364_v41 }
  0x2b   : > { %280 = vmatpush1.msra.mxu0 %v237_v23  ;;  %593 = vmatpush3.msra.mxu1 %v364_v41 }
  0x2c   : > { %281 = vmatprep.subr.mxu0 %v236_v24  ;;  %594 = vmatprep.subr.mxu1 %v363_v42 }
  0x2d   : > { %282 = vmatpush1.msra.mxu0 %v235_v25  ;;  %595 = vmatpush3.msra.mxu1 %v363_v42 }
  0x2e   : > { %283 = vmatprep.subr.mxu0 %v234_v26  ;;  %596 = vmatprep.subr.mxu1 %v362_v43 }
  0x2f   : > { %284 = vmatpush1.msra.mxu0 %v233_v27  ;;  %597 = vmatpush3.msra.mxu1 %v362_v43 }
  0x30   : > { %285 = vmatprep.subr.mxu0 %v232_v28  ;;  %598 = vmatprep.subr.mxu1 %v361_v44 }
  0x31   : > { %286 = vmatpush1.msra.mxu0 %v231_v29  ;;  %599 = vmatpush3.msra.mxu1 %v361_v44 }
  0x32   : > { %287 = vmatprep.subr.mxu0 %v230_v30  ;;  %600 = vmatprep.subr.mxu1 %v360_v45 }
  0x33   : > { %288 = vmatpush1.msra.mxu0 %v229_v31  ;;  %601 = vmatpush3.msra.mxu1 %v360_v45 }
  0x34   : > { %289 = vmatprep.subr.mxu0 %v228_v32  ;;  %602 = vmatprep.subr.mxu1 %v359_v46 }
  0x35   : > { %290 = vmatpush1.msra.mxu0 %v227_v33  ;;  %603 = vmatpush3.msra.mxu1 %v359_v46 }
  0x36   : > { %324 = vmatmul.mubr.f32.vlgmr.msra.gmra.mxu0 %v225_v34  ;;  %604 = vmatprep.subr.mxu1 %v358_v47 }
  0x37   : > { %329 = vmatprep.mubr.f32.mxu0 %v713_v5  ;;  %605 = vmatpush3.msra.mxu1 %v358_v47 }
  0x38   : > { %606 = vmatprep.subr.mxu1 %v357_v48 }
  0x39   : > { %607 = vmatpush3.msra.mxu1 %v357_v48 }
  0x3a   : > { %330 = vmatmul.mubr.f32.gmra.mxu0 %v226_v35  ;;  %608 = vmatprep.subr.mxu1 %v356_v49 }
  0x3b   : > { %609 = vmatpush3.msra.mxu1 %v356_v49 }
  0x3c   : > { %610 = vmatprep.subr.mxu1 %v355_v50 }
  0x3d   : > { %611 = vmatpush3.msra.mxu1 %v355_v50 }
  0x3e   : > { %612 = vmatprep.subr.mxu1 %v354_v51 }
  0x3f   : > { %613 = vmatpush3.msra.mxu1 %v354_v51 }
  0xf6   : > { %v325_v52 = vpop.f32.mrf.mxu0 }
  0xf7   : > { %v556_v53 = vmul.f32 -1.442695, %v325_v52 }
  0xf8   : > { %v327_v54 = vpop.f32.mrf.mxu0 }
  0xf9   : > { %652 = vpow2.f32 %v556_v53 }
  0xfa   : > { %v331_v55 = vpop.f32.mrf.mxu0 }
  0xfb   : > { %v557_v56 = vmul.f32 -1.442695, %v331_v55 }
  0xfc   : > { %v333_v2 = vpop.f32.mrf.mxu0 }
  0xfd   : > { %654 = vpow2.f32 %v557_v56 }
 0x106   : > { %v653_v57 = vpop.eup %652 }
 0x107   : > { %v342_v58 = vadd.f32 1.0, %v653_v57 }
 0x109   : > { %656 = vrcp.f32 %v342_v58 }
 0x10a   : > { %v655_v59 = vpop.eup %654 }
 0x10b   : > { %v343_v60 = vadd.f32 1.0, %v655_v59 }
 0x10d   : > { %658 = vrcp.f32 %v343_v60 }
 0x116   : > { %v657_v61 = vpop.eup %656 }
 0x117   : > { %v348_v62 = vmul.f32 %v657_v61, %v325_v52 }
 0x119   : > { %v350_v63 = vmul.f32 %v348_v62, %v327_v54 }
 0x11a   : > { %v659_v0 = vpop.eup %658 }
 0x11b   : > { %v349_v1 = vmul.f32 %v659_v0, %v331_v55  ;;  %614 = vmatprep.mubr.f32.mxu1 %v350_v63 }
 0x11d   : > { %v351_v3 = vmul.f32 %v349_v1, %v333_v2 }
 0x11f   : > { %615 = vmatmul.mubr.f32.vlgmr.msra.gmra.mxu1 %v351_v3 }
 0x1df   : > { %v616_v5 = vpop.f32.mrf.mxu1 }
 0x1e0   : > { %v446_v7 = vadd.f32 %v616_v5, %v353_v4  ;;  %452 = sbr.rel (%p558_p7) target bundleno = 493 (0x1ed), region = 40 }
 0x1e1   : > { %v436_v8 = vpop.f32.mrf.mxu1 }
 0x1e2   : > { %448 = vst [vmem:[#allocation2 + $0x8] sm:$0xff] %v446_v7  ;;  %v445_v9 = vadd.f32 %v436_v8, %v352_v6 }
 0x1e4   : > { %447 = vst [vmem:[#allocation2] sm:$0xff] %v445_v9 }
 0x1e9   : > { %v454_v11 = vld [vmem:[#allocation2 + $0x8] sm:$0xff] }
 0x1ea   : > { %456 = vst [vmem:[#allocation3 + $0x8] sm:$0xff] %v454_v11 }
 0x1eb   : > { %v453_v10 = vld [vmem:[#allocation2] sm:$0xff] }
 0x1ec   : > { %455 = vst [vmem:[#allocation3] sm:$0xff] %v453_v10 }
 0x1ed PF: > { %p829_p8 = scmp.eq.s32.totalorder %s546_s15, 1  ;;  %s714_s5 = smov [#allocation3]  }
 0x1ee   : > { %s466_s6 = sshll.u32 %s714_s5, 4  ;;  %s467_s6 = int_to_ptr.vmem [resolvable:$true] %s466_s6 }
 0x1ef   : > { %s660_s7 = scalar_lea.vmem %s467_s6, 256  ;;  %p667_p12 = scmp.lt.s32.totalorder %s467_s6, %s467_s6 }
 0x1f0   : > { %p661_p9 = scmp.ne.s32.totalorder %s467_s6, %s660_s7  ;;  %p668_p13 = scmp.lt.s32.totalorder %s660_s7, %s660_s7 }
 0x1f2   : > { %p662_p10 = pnand %p661_p9, %p829_p8  ;;  %p669_p0 = por %p668_p13, %p667_p12 }
 0x1f4   : > { %p663_p11 = pneg %p662_p10 }
 0x1f6   : > { %p670_p1 = pnand %p669_p0, %p663_p11 }
 0x1f8   : > { %673 = shalt.err (!%p670_p1)
}
 0x1f9   : > { %s715_s8 = smov 128   ;;  %s716_s9 = smov 8  }
 0x1fa   : > { %618 = dma.vmem_to_hbm [thread:$0]  (%p829_p8), %s467_s6, 256, %s856_s3, [#allocation4], %s715_s8, %s715_s8, %s716_s9  }
 0x1fb   : > { %697 = dma.done.wait (%p829_p8), [#allocation4], 256  }
 0x1fc   : > { %699 = vsyncadd (%p829_p8), [#allocation4], 4294967040 }
 0x1fd PF: > { %s14_s14 = sadd.s32 1, %s710_s14   ;;  %s858_s12 = smov %s706_s13 }
 0x1fe   : > { %p11_p2 = scmp.ge.s32.totalorder %s14_s14, 4   ;;  %s859_s13 = smov %s861_s16 }
 0x200   :  { %13 = sbr.rel (!%p11_p2) target bundleno = 2 (0x2), region = 74 }
 0x205   :  { %482 = vsyncpa [#allocation4], 1 }
 0x206   :  { %484 = vsyncpa [#allocation4 + $0x1], 1 }

</bundles_post_ra>
